<compile_context>
chip_gen: v7x
topology: tpu7x:2x2x1
jax: 0.10.0
libtpu: 0.0.40
codegen_flags: <defaults>
</compile_context>

<pallas_src>
import functools

import jax
import jax.numpy as jnp
import numpy as np
from jax.experimental import pallas as pl
from jax.experimental.pallas import tpu as pltpu

_INV_SQRT2 = 0.7071067811865476


def _gelu_exact(x):
    # torch.nn.functional.gelu default = exact erf-based gelu
    return 0.5 * x * (1.0 + jax.lax.erf(x * _INV_SQRT2))


def _round_up(x, m):
    return ((x + m - 1) // m) * m


# ----------------------------------------------------------------------------
# Kernel
# ----------------------------------------------------------------------------
def _dishts_kernel(x_ref, wl_ref, wh_ref, s_ref, t_ref, g_ref, b_ref,
                   out_ref, stats_ref, *, n_series, inv_lm1):
    """One batch tile: x_ref (Bt, L*N) -> out_ref (Bt, L*N), stats_ref (Bt, 4*N)."""
    f32 = jnp.float32
    hi = jax.lax.Precision.HIGHEST  # keep f32 matmul at full precision on MXU
    x = x_ref[...].astype(f32)                                           # (Bt, LN)

    # theta_k[b, n] = sum_l x[b, l, n] * reduce_mlayer[n, l, k]
    # (block-diagonal MXU matmul over the flat (l, n) lane axis)
    phil = _gelu_exact(jnp.dot(x, wl_ref[...],
                               precision=hi, preferred_element_type=f32))  # (Bt, N)
    phih = _gelu_exact(jnp.dot(x, wh_ref[...],
                               precision=hi, preferred_element_type=f32))  # (Bt, N)

    # Broadcast per-series stats back onto the flat (l, n) lane axis.
    phil_t = jnp.dot(phil, t_ref[...], precision=hi, preferred_element_type=f32)
    phih_t = jnp.dot(phih, t_ref[...], precision=hi, preferred_element_type=f32)

    dl = x - phil_t
    dh = x - phih_t
    # xi{l,h}[b, n] = sum_l (x - phi)^2 / (L - 1)
    xil = jnp.dot(dl * dl, s_ref[...],
                  precision=hi, preferred_element_type=f32) * inv_lm1      # (Bt, N)
    xih = jnp.dot(dh * dh, s_ref[...],
                  precision=hi, preferred_element_type=f32) * inv_lm1      # (Bt, N)
    xil_t = jnp.dot(xil, t_ref[...], precision=hi, preferred_element_type=f32)

    # forward_process: (x - phil) / sqrt(xil + 1e-8) * gamma + beta
    scale = jax.lax.rsqrt(xil_t + 1e-8) * g_ref[...]                       # (Bt, LN)
    out_ref[...] = (dl * scale + b_ref[...]).astype(out_ref.dtype)

    # Fused stats output: four direct sub-slice stores (no concatenate).
    n = n_series
    stats_ref[:, 0 * n:1 * n] = phil
    stats_ref[:, 1 * n:2 * n] = phih
    stats_ref[:, 2 * n:3 * n] = xil
    stats_ref[:, 3 * n:4 * n] = xih


# ----------------------------------------------------------------------------
# Tiling / dispatch helpers
# ----------------------------------------------------------------------------
def _choose_batch_tile(B, ln, itemsize, sublane):
    """Batch (sublane-axis) tile: ~1 MiB of x per block to amortize the
    ~0.35us/step pipeline overhead (measured ~85% of HBM roofline at that
    size), but split into >= 2 grid steps once there is >= ~1 MiB of work so
    the "parallel" grid axis can feed both v7x TensorCores."""
    b_al = _round_up(max(B, 1), sublane)
    row_bytes = max(ln * itemsize, 1)
    tile = max(sublane, min(8192, ((1 << 20) // row_bytes) // sublane * sublane))
    if tile >= b_al:
        if b_al >= 2 * sublane and b_al * row_bytes >= (1 << 20):
            tile = _round_up(pl.cdiv(b_al, 2), sublane)   # >= 2 steps (v7x megacore)
        else:
            tile = b_al                                   # single block
    steps = pl.cdiv(b_al, tile)
    tile = _round_up(pl.cdiv(b_al, steps), sublane)       # minimize batch padding
    return tile, tile * steps


def _vmem_limit_bytes(tile, ln, n, in_item, out_item):
    """Explicit scoped-VMEM budget (double-buffered pipeline blocks plus a
    generous allowance for the in-kernel f32 temporaries), capped for v7x."""
    lanes = lambda d: _round_up(d, 128)
    x_blk = tile * lanes(ln) * in_item
    o_blk = tile * lanes(ln) * out_item
    w_blk = 3 * _round_up(ln, 8) * lanes(n) * 4 + _round_up(n, 8) * lanes(ln) * 4
    gb_blk = 2 * 8 * lanes(ln) * 4
    st_blk = tile * lanes(4 * n) * 4
    pipeline = 2 * (x_blk + o_blk + w_blk + gb_blk + st_blk)   # double buffers
    temporaries = 10 * tile * lanes(ln) * 4                     # live f32 values
    need = pipeline + temporaries
    return int(min(64 << 20, max(24 << 20, need)))


def _should_use_pallas(B, L, N):
    total = B * L * N
    weight_bytes = 4 * N * (L * N) * 4      # Wl + Wh + S + T, f32
    return total >= (1 << 14) and weight_bytes <= (2 << 20)


# ----------------------------------------------------------------------------
# Pure-JAX mirror of the PyTorch forward (also the tiny-shape fallback)
# ----------------------------------------------------------------------------
def _dishts_forward_ref(batch_x, reduce_mlayer, gamma, beta):
    B, L, N = batch_x.shape
    x = batch_x.astype(jnp.float32)
    x_t = jnp.transpose(x, (2, 0, 1))                                # (N, B, L)
    theta = jnp.einsum('nbl,nlk->nbk', x_t, reduce_mlayer.astype(jnp.float32))
    theta = jnp.transpose(theta, (1, 2, 0))                          # (B, 2, N)
    theta = _gelu_exact(theta)
    phil, phih = theta[:, :1, :], theta[:, 1:, :]
    xil = jnp.sum((x - phil) ** 2, axis=1, keepdims=True) / (L - 1)
    xih = jnp.sum((x - phih) ** 2, axis=1, keepdims=True) / (L - 1)
    out = ((x - phil) / jnp.sqrt(xil + 1e-8) * gamma.astype(jnp.float32)
           + beta.astype(jnp.float32))
    return out.astype(batch_x.dtype), phil, phih, xil, xih


# ----------------------------------------------------------------------------
# Public forward
# ----------------------------------------------------------------------------
def dishts_forward(batch_x, reduce_mlayer, gamma, beta, force_pallas=None):
    """DishTS.forward(batch_x, mode='forward', dec_inp=None).

    Returns (normalized_x, phil, phih, xil, xih); phih/xih are the state the
    module caches for the inverse path.  dec_inp is None in this config.
    """
    B, L, N = batch_x.shape
    use_pallas = _should_use_pallas(B, L, N) if force_pallas is None else force_pallas
    if not use_pallas:
        # Tiny problems (the module's default B=2/L=8/N=4 config): the
        # pallas_call fixed cost dwarfs the math, let XLA fuse the plain path.
        # TODO(synk): very large N (block-diagonal weights > ~2 MiB) would need
        # the per-(l,n) elementwise kernel variant instead of the matmul one.
        return _dishts_forward_ref(batch_x, reduce_mlayer, gamma, beta)

    LN = L * N
    in_dtype = batch_x.dtype
    itemsize = jnp.dtype(in_dtype).itemsize
    sublane = {4: 8, 2: 16, 1: 32}.get(itemsize, 8)
    tile, b_pad = _choose_batch_tile(B, LN, itemsize, sublane)

    # ---- wrapper-side prep: free reshape; zero-pad batch only if needed ----
    x_flat = batch_x.reshape(B, LN)
    if b_pad != B:
        x_flat = jnp.pad(x_flat, ((0, b_pad - B), (0, 0)))

    f32 = jnp.float32
    rm_t = jnp.transpose(reduce_mlayer.astype(f32), (1, 0, 2))       # (L, N, 2)
    eye_n = jnp.eye(N, dtype=f32)
    # Wk[l*N + n, n'] = rm[n, l, k] * (n == n')
    wl = (rm_t[:, :, 0][:, :, None] * eye_n[None, :, :]).reshape(LN, N)
    wh = (rm_t[:, :, 1][:, :, None] * eye_n[None, :, :]).reshape(LN, N)
    # S[l*N + n, n'] = (n == n');  T[n, l*N + n'] = (n == n')
    smat = jnp.broadcast_to(eye_n[None, :, :], (L, N, N)).reshape(LN, N)
    tmat = jnp.broadcast_to(eye_n[:, None, :], (N, L, N)).reshape(N, LN)
    gamma_t = jnp.tile(gamma.astype(f32), L).reshape(1, LN)
    beta_t = jnp.tile(beta.astype(f32), L).reshape(1, LN)

    grid = (b_pad // tile,)
    kernel = functools.partial(
        _dishts_kernel, n_series=N,
        inv_lm1=float(1.0 / (L - 1)) if L > 1 else float('inf'))
    const = lambda i: (0, 0)   # grid-invariant blocks: DMA'd once, kept in VMEM

    out_flat, stats = pl.pallas_call(
        kernel,
        out_shape=(
            jax.ShapeDtypeStruct((b_pad, LN), in_dtype),     # normalized x
            jax.ShapeDtypeStruct((b_pad, 4 * N), f32),       # phil|phih|xil|xih
        ),
        grid=grid,
        in_specs=[
            pl.BlockSpec((tile, LN), lambda i: (i, 0)),      # x (streamed)
            pl.BlockSpec((LN, N), const),                    # Wl (invariant)
            pl.BlockSpec((LN, N), const),                    # Wh (invariant)
            pl.BlockSpec((LN, N), const),                    # S  (invariant)
            pl.BlockSpec((N, LN), const),                    # T  (invariant)
            pl.BlockSpec((1, LN), const),                    # gamma (invariant)
            pl.BlockSpec((1, LN), const),                    # beta  (invariant)
        ],
        out_specs=(
            pl.BlockSpec((tile, LN), lambda i: (i, 0)),
            pl.BlockSpec((tile, 4 * N), lambda i: (i, 0)),
        ),
        compiler_params=pltpu.CompilerParams(
            dimension_semantics=("parallel",),
            vmem_limit_bytes=_vmem_limit_bytes(tile, LN, N, itemsize, itemsize),
        ),
    )(x_flat, wl, wh, smat, tmat, gamma_t, beta_t)

    # ---- undo padding / unpack fused stats (tiny arrays) --------------------
    out = out_flat[:B].reshape(B, L, N)
    stats = stats[:B]
    phil = stats[:, 0 * N:1 * N].reshape(B, 1, N)
    phih = stats[:, 1 * N:2 * N].reshape(B, 1, N)
    xil = stats[:, 2 * N:3 * N].reshape(B, 1, N)
    xih = stats[:, 3 * N:4 * N].reshape(B, 1, N)
    return out, phil, phih, xil, xih


# ----------------------------------------------------------------------------
# Self-test
# ----------------------------------------------------------------------------
if __name__ == "__main__":
    key = jax.random.PRNGKey(0)

    def run_case(B, L, N, case_key, random_affine, force_pallas=None, tol=1e-5):
        k_x, k_w, k_g, k_b = jax.random.split(case_key, 4)
        batch_x = jax.random.normal(k_x, (B, L, N), dtype=jnp.float32)
        # init == 'standard': torch.rand(n_series, lookback, 2) / lookback
        reduce_mlayer = jax.random.uniform(k_w, (N, L, 2), dtype=jnp.float32) / L
        if random_affine:
            gamma = jax.random.normal(k_g, (N,), dtype=jnp.float32)
            beta = jax.random.normal(k_b, (N,), dtype=jnp.float32)
        else:
            gamma = jnp.ones((N,), jnp.float32)
            beta = jnp.zeros((N,), jnp.float32)

        outs = dishts_forward(batch_x, reduce_mlayer, gamma, beta,
                              force_pallas=force_pallas)
        jax.block_until_ready(outs)
        refs = _dishts_forward_ref(batch_x, reduce_mlayer, gamma, beta)
        for got, want in zip(outs, refs):
            np.testing.assert_allclose(np.asarray(got), np.asarray(want),
                                       rtol=tol, atol=tol)

    k1, k2, k3 = jax.random.split(key, 3)
    # Module's small config (cfg.DATA.N_VAR = 4, cfg.DATA.SEQ_LEN = 8):
    # auto-dispatch takes the fused pure-JAX path, but we also force it
    # through the Pallas kernel once to validate the kernel at this shape.
    run_case(2, 8, 4, k1, random_affine=False, force_pallas=True)
    run_case(2, 8, 4, k1, random_affine=False)           # auto: JAX fallback path
    # Lane-dense single-step kernel path (L*N = 128 lanes, one batch tile).
    run_case(256, 8, 16, k2, random_affine=True)
    # Multi-step "parallel" grid + batch padding (B=2100 -> 2 tiles of 1056).
    run_case(2100, 8, 16, k3, random_affine=True)

    print("KERNEL_OK")
</pallas_src>

<mosaic_0001>
module attributes {stable_mosaic.version = 11 : i64} {
  func.func @_dishts_kernel(%arg0: i32, %arg1: memref<8x32xf32, #tpu.memory_space<vmem>>, %arg2: memref<32x4xf32, #tpu.memory_space<vmem>>, %arg3: memref<32x4xf32, #tpu.memory_space<vmem>>, %arg4: memref<32x4xf32, #tpu.memory_space<vmem>>, %arg5: memref<4x32xf32, #tpu.memory_space<vmem>>, %arg6: memref<1x32xf32, #tpu.memory_space<vmem>>, %arg7: memref<1x32xf32, #tpu.memory_space<vmem>>, %arg8: memref<8x32xf32, #tpu.memory_space<vmem>>, %arg9: memref<8x16xf32, #tpu.memory_space<vmem>>) attributes {dimension_semantics = [#tpu.dimension_semantics<parallel>], iteration_bounds = array<i64: 1>, scalar_prefetch = 0 : i64, scratch_operands = 0 : i64, tpu.core_type = #tpu.core_type<tc>, window_params = [{transform_indices = @transform_0, window_bounds = array<i64: 8, 32>}, {pipeline_mode = #tpu.pipeline_mode<synchronous>, transform_indices = @transform_1, window_bounds = array<i64: 32, 4>}, {pipeline_mode = #tpu.pipeline_mode<synchronous>, transform_indices = @transform_2, window_bounds = array<i64: 32, 4>}, {pipeline_mode = #tpu.pipeline_mode<synchronous>, transform_indices = @transform_3, window_bounds = array<i64: 32, 4>}, {pipeline_mode = #tpu.pipeline_mode<synchronous>, transform_indices = @transform_4, window_bounds = array<i64: 4, 32>}, {pipeline_mode = #tpu.pipeline_mode<synchronous>, transform_indices = @transform_5, window_bounds = array<i64: 1, 32>}, {pipeline_mode = #tpu.pipeline_mode<synchronous>, transform_indices = @transform_6, window_bounds = array<i64: 1, 32>}, {transform_indices = @transform_7, window_bounds = array<i64: 8, 32>}, {transform_indices = @transform_8, window_bounds = array<i64: 8, 16>}]} {
    %c0 = arith.constant 0 : index
    %c0_0 = arith.constant 0 : index
    %0 = vector.load %arg1[%c0, %c0_0] : memref<8x32xf32, #tpu.memory_space<vmem>>, vector<8x32xf32>
    %c0_1 = arith.constant 0 : index
    %c0_2 = arith.constant 0 : index
    %1 = vector.load %arg2[%c0_1, %c0_2] : memref<32x4xf32, #tpu.memory_space<vmem>>, vector<32x4xf32>
    %cst = arith.constant dense<0.000000e+00> : vector<8x4xf32>
    %2 = tpu.matmul %0, %1, %cst {dimension_numbers = #tpu.dot_dimension_numbers<[1], [0], [0], [1], [0, 0, 1, 1], [], []>, precision = #tpu.contract_precision<fp32>} : vector<8x32xf32>, vector<32x4xf32>, vector<8x4xf32> -> vector<8x4xf32>
    %cst_3 = arith.constant 5.000000e-01 : f32
    %3 = vector.broadcast %cst_3 : f32 to vector<8x4xf32>
    %4 = arith.mulf %3, %2 : vector<8x4xf32>
    %cst_4 = arith.constant 0.707106769 : f32
    %5 = vector.broadcast %cst_4 : f32 to vector<8x4xf32>
    %6 = arith.mulf %2, %5 : vector<8x4xf32>
    %7 = math.erf %6 : vector<8x4xf32>
    %cst_5 = arith.constant 1.000000e+00 : f32
    %8 = vector.broadcast %cst_5 : f32 to vector<8x4xf32>
    %9 = arith.addf %8, %7 : vector<8x4xf32>
    %10 = arith.mulf %4, %9 : vector<8x4xf32>
    %c0_6 = arith.constant 0 : index
    %c0_7 = arith.constant 0 : index
    %11 = vector.load %arg3[%c0_6, %c0_7] : memref<32x4xf32, #tpu.memory_space<vmem>>, vector<32x4xf32>
    %cst_8 = arith.constant dense<0.000000e+00> : vector<8x4xf32>
    %12 = tpu.matmul %0, %11, %cst_8 {dimension_numbers = #tpu.dot_dimension_numbers<[1], [0], [0], [1], [0, 0, 1, 1], [], []>, precision = #tpu.contract_precision<fp32>} : vector<8x32xf32>, vector<32x4xf32>, vector<8x4xf32> -> vector<8x4xf32>
    %cst_9 = arith.constant 5.000000e-01 : f32
    %13 = vector.broadcast %cst_9 : f32 to vector<8x4xf32>
    %14 = arith.mulf %13, %12 : vector<8x4xf32>
    %cst_10 = arith.constant 0.707106769 : f32
    %15 = vector.broadcast %cst_10 : f32 to vector<8x4xf32>
    %16 = arith.mulf %12, %15 : vector<8x4xf32>
    %17 = math.erf %16 : vector<8x4xf32>
    %cst_11 = arith.constant 1.000000e+00 : f32
    %18 = vector.broadcast %cst_11 : f32 to vector<8x4xf32>
    %19 = arith.addf %18, %17 : vector<8x4xf32>
    %20 = arith.mulf %14, %19 : vector<8x4xf32>
    %c0_12 = arith.constant 0 : index
    %c0_13 = arith.constant 0 : index
    %21 = vector.load %arg5[%c0_12, %c0_13] : memref<4x32xf32, #tpu.memory_space<vmem>>, vector<4x32xf32>
    %cst_14 = arith.constant dense<0.000000e+00> : vector<8x32xf32>
    %22 = tpu.matmul %10, %21, %cst_14 {dimension_numbers = #tpu.dot_dimension_numbers<[1], [0], [0], [1], [0, 0, 1, 1], [], []>, precision = #tpu.contract_precision<fp32>} : vector<8x4xf32>, vector<4x32xf32>, vector<8x32xf32> -> vector<8x32xf32>
    %c0_15 = arith.constant 0 : index
    %c0_16 = arith.constant 0 : index
    %23 = vector.load %arg5[%c0_15, %c0_16] : memref<4x32xf32, #tpu.memory_space<vmem>>, vector<4x32xf32>
    %cst_17 = arith.constant dense<0.000000e+00> : vector<8x32xf32>
    %24 = tpu.matmul %20, %23, %cst_17 {dimension_numbers = #tpu.dot_dimension_numbers<[1], [0], [0], [1], [0, 0, 1, 1], [], []>, precision = #tpu.contract_precision<fp32>} : vector<8x4xf32>, vector<4x32xf32>, vector<8x32xf32> -> vector<8x32xf32>
    %25 = arith.subf %0, %22 : vector<8x32xf32>
    %26 = arith.subf %0, %24 : vector<8x32xf32>
    %27 = arith.mulf %25, %25 : vector<8x32xf32>
    %c0_18 = arith.constant 0 : index
    %c0_19 = arith.constant 0 : index
    %28 = vector.load %arg4[%c0_18, %c0_19] : memref<32x4xf32, #tpu.memory_space<vmem>>, vector<32x4xf32>
    %cst_20 = arith.constant dense<0.000000e+00> : vector<8x4xf32>
    %29 = tpu.matmul %27, %28, %cst_20 {dimension_numbers = #tpu.dot_dimension_numbers<[1], [0], [0], [1], [0, 0, 1, 1], [], []>, precision = #tpu.contract_precision<fp32>} : vector<8x32xf32>, vector<32x4xf32>, vector<8x4xf32> -> vector<8x4xf32>
    %cst_21 = arith.constant 0.142857149 : f32
    %30 = vector.broadcast %cst_21 : f32 to vector<8x4xf32>
    %31 = arith.mulf %29, %30 : vector<8x4xf32>
    %32 = arith.mulf %26, %26 : vector<8x32xf32>
    %c0_22 = arith.constant 0 : index
    %c0_23 = arith.constant 0 : index
    %33 = vector.load %arg4[%c0_22, %c0_23] : memref<32x4xf32, #tpu.memory_space<vmem>>, vector<32x4xf32>
    %cst_24 = arith.constant dense<0.000000e+00> : vector<8x4xf32>
    %34 = tpu.matmul %32, %33, %cst_24 {dimension_numbers = #tpu.dot_dimension_numbers<[1], [0], [0], [1], [0, 0, 1, 1], [], []>, precision = #tpu.contract_precision<fp32>} : vector<8x32xf32>, vector<32x4xf32>, vector<8x4xf32> -> vector<8x4xf32>
    %cst_25 = arith.constant 0.142857149 : f32
    %35 = vector.broadcast %cst_25 : f32 to vector<8x4xf32>
    %36 = arith.mulf %34, %35 : vector<8x4xf32>
    %c0_26 = arith.constant 0 : index
    %c0_27 = arith.constant 0 : index
    %37 = vector.load %arg5[%c0_26, %c0_27] : memref<4x32xf32, #tpu.memory_space<vmem>>, vector<4x32xf32>
    %cst_28 = arith.constant dense<0.000000e+00> : vector<8x32xf32>
    %38 = tpu.matmul %31, %37, %cst_28 {dimension_numbers = #tpu.dot_dimension_numbers<[1], [0], [0], [1], [0, 0, 1, 1], [], []>, precision = #tpu.contract_precision<fp32>} : vector<8x4xf32>, vector<4x32xf32>, vector<8x32xf32> -> vector<8x32xf32>
    %cst_29 = arith.constant 9.99999993E-9 : f32
    %39 = vector.broadcast %cst_29 : f32 to vector<8x32xf32>
    %40 = arith.addf %38, %39 : vector<8x32xf32>
    %41 = math.rsqrt %40 : vector<8x32xf32>
    %c0_30 = arith.constant 0 : index
    %c0_31 = arith.constant 0 : index
    %42 = vector.load %arg6[%c0_30, %c0_31] : memref<1x32xf32, #tpu.memory_space<vmem>>, vector<1x32xf32>
    %43 = vector.broadcast %42 : vector<1x32xf32> to vector<8x32xf32>
    %44 = arith.mulf %41, %43 : vector<8x32xf32>
    %45 = arith.mulf %25, %44 : vector<8x32xf32>
    %c0_32 = arith.constant 0 : index
    %c0_33 = arith.constant 0 : index
    %46 = vector.load %arg7[%c0_32, %c0_33] : memref<1x32xf32, #tpu.memory_space<vmem>>, vector<1x32xf32>
    %47 = vector.broadcast %46 : vector<1x32xf32> to vector<8x32xf32>
    %48 = arith.addf %45, %47 : vector<8x32xf32>
    %c0_34 = arith.constant 0 : index
    %c0_35 = arith.constant 0 : index
    %49 = vector.load %arg8[%c0_34, %c0_35] : memref<8x32xf32, #tpu.memory_space<vmem>>, vector<8x32xf32>
    tpu.vector_store %arg8[%c0_34, %c0_35], %48 {strides = array<i32>} : memref<8x32xf32, #tpu.memory_space<vmem>>, vector<8x32xf32>,
    %c0_36 = arith.constant 0 : index
    %c0_37 = arith.constant 0 : index
    %50 = vector.load %arg9[%c0_36, %c0_37] : memref<8x16xf32, #tpu.memory_space<vmem>>, vector<8x4xf32>
    tpu.vector_store %arg9[%c0_36, %c0_37], %10 {strides = array<i32>} : memref<8x16xf32, #tpu.memory_space<vmem>>, vector<8x4xf32>,
    %c0_38 = arith.constant 0 : index
    %c4 = arith.constant 4 : index
    %51 = vector.load %arg9[%c0_38, %c4] : memref<8x16xf32, #tpu.memory_space<vmem>>, vector<8x4xf32>
    tpu.vector_store %arg9[%c0_38, %c4], %20 {strides = array<i32>} : memref<8x16xf32, #tpu.memory_space<vmem>>, vector<8x4xf32>,
    %c0_39 = arith.constant 0 : index
    %c8 = arith.constant 8 : index
    %52 = vector.load %arg9[%c0_39, %c8] : memref<8x16xf32, #tpu.memory_space<vmem>>, vector<8x4xf32>
    tpu.vector_store %arg9[%c0_39, %c8], %31 {strides = array<i32>} : memref<8x16xf32, #tpu.memory_space<vmem>>, vector<8x4xf32>,
    %c0_40 = arith.constant 0 : index
    %c12 = arith.constant 12 : index
    %53 = vector.load %arg9[%c0_40, %c12] : memref<8x16xf32, #tpu.memory_space<vmem>>, vector<8x4xf32>
    tpu.vector_store %arg9[%c0_40, %c12], %36 {strides = array<i32>} : memref<8x16xf32, #tpu.memory_space<vmem>>, vector<8x4xf32>,
    return
  }
  func.func @transform_0(%arg0: i32) -> (i32, i32) {
    %c0_i32 = arith.constant 0 : i32
    %c0_i32_0 = arith.constant 0 : i32
    return %arg0, %c0_i32 : i32, i32
  }
  func.func @transform_1(%arg0: i32) -> (i32, i32) {
    %c0_i32 = arith.constant 0 : i32
    %c0_i32_0 = arith.constant 0 : i32
    %c0_i32_1 = arith.constant 0 : i32
    return %c0_i32, %c0_i32_0 : i32, i32
  }
  func.func @transform_2(%arg0: i32) -> (i32, i32) {
    %c0_i32 = arith.constant 0 : i32
    %c0_i32_0 = arith.constant 0 : i32
    %c0_i32_1 = arith.constant 0 : i32
    return %c0_i32, %c0_i32_0 : i32, i32
  }
  func.func @transform_3(%arg0: i32) -> (i32, i32) {
    %c0_i32 = arith.constant 0 : i32
    %c0_i32_0 = arith.constant 0 : i32
    %c0_i32_1 = arith.constant 0 : i32
    return %c0_i32, %c0_i32_0 : i32, i32
  }
  func.func @transform_4(%arg0: i32) -> (i32, i32) {
    %c0_i32 = arith.constant 0 : i32
    %c0_i32_0 = arith.constant 0 : i32
    %c0_i32_1 = arith.constant 0 : i32
    return %c0_i32, %c0_i32_0 : i32, i32
  }
  func.func @transform_5(%arg0: i32) -> (i32, i32) {
    %c0_i32 = arith.constant 0 : i32
    %c0_i32_0 = arith.constant 0 : i32
    %c0_i32_1 = arith.constant 0 : i32
    return %c0_i32, %c0_i32_0 : i32, i32
  }
  func.func @transform_6(%arg0: i32) -> (i32, i32) {
    %c0_i32 = arith.constant 0 : i32
    %c0_i32_0 = arith.constant 0 : i32
    %c0_i32_1 = arith.constant 0 : i32
    return %c0_i32, %c0_i32_0 : i32, i32
  }
  func.func @transform_7(%arg0: i32) -> (i32, i32) {
    %c0_i32 = arith.constant 0 : i32
    %c0_i32_0 = arith.constant 0 : i32
    return %arg0, %c0_i32 : i32, i32
  }
  func.func @transform_8(%arg0: i32) -> (i32, i32) {
    %c0_i32 = arith.constant 0 : i32
    %c0_i32_0 = arith.constant 0 : i32
    return %arg0, %c0_i32 : i32, i32
  }
}

</mosaic_0001>

<bundles_post_ra>
// kernel: tpu_custom_call.1
= control target key start
LH: loop header
LB: loop body
LE: loop exit
PB: predicated region body
PF: predicated region fallthrough
CT: control target
= control target key end

     0   :  { %14 = vsyncpa [#allocation3], 0  ;;  %v4213_v3 = vmov 0.0|0.0   ;;  %vm4214_vm0 = vmmov 0   ;;  %v4215_v8 = vmov 0.0   ;;  %vm35_vm1 = vcmask 261120   ;;  %s4676_s0 = inlined_call_operand.vmem [shape: f32[8,32], index: 0, kind: input, shape index: {}]   ;;  %s4677_s1 = inlined_call_operand.vmem [shape: f32[32,4], index: 1, kind: input, shape index: {}]   ;;  %s4678_s2 = inlined_call_operand.vmem [shape: f32[32,4], index: 2, kind: input, shape index: {}]   ;;  %s4679_s3 = inlined_call_operand.vmem [shape: f32[32,4], index: 3, kind: input, shape index: {}]   ;;  %s4680_s4 = inlined_call_operand.vmem [shape: f32[4,32], index: 4, kind: input, shape index: {}]   ;;  %s4681_s5 = inlined_call_operand.vmem [shape: f32[1,32], index: 5, kind: input, shape index: {}]   ;;  %s4682_s6 = inlined_call_operand.vmem [shape: f32[1,32], index: 6, kind: input, shape index: {}]   ;;  %s4683_s7 = inlined_call_operand.hbm [shape: f32[8,32], index: 7, kind: output, shape index: {0}]   ;;  %s4684_s8 = inlined_call_operand.hbm [shape: f32[8,16], index: 8, kind: output, shape index: {1}]  }
   0x1   :  { %v31_v0 = vld [vmem:[%s4677_s1] sm:$0xff]  ;;  %v32_v1 = vld [vmem:[%s4677_s1 + $0x8] sm:$0xff]  ;;  %v33_v2 = vld [vmem:[%s4677_s1 + $0x10] sm:$0xff]  ;;  %3938 = vmatprep.subr.bf16.mxu1 %v4213_v3  ;;  %3592 = vmatprep.mubr.msk.f32.mxu1 %vm4214_vm0, %v4215_v8 }
   0x2   :  { %v40_v4 = vand.u32 4294901760, %v31_v0  ;;  %v43_v5 = vand.u32 4294901760, %v32_v1  ;;  %v34_v6 = vld [vmem:[%s4677_s1 + $0x18] sm:$0xff]  ;;  %v46_v7 = vand.u32 4294901760, %v33_v2  ;;  %v4284_v9 = vld [vmem:[%s4676_s0] sm:$0xff]  ;;  %3944 = vmatprep.subr.bf16.mxu0 %v4213_v3  ;;  %v530_v13 = vld [vmem:[%s4678_s2 + $0x8] sm:$0xff]  ;;  %3603 = vmatprep.mubr.msk.f32.mxu0 %vm4214_vm0, %v4215_v8 }
   0x3   :  { %v49_v10 = vand.u32 4294901760, %v34_v6  ;;  %v37_v11 = vsel %vm35_vm1, %v4284_v9, 0  ;;  %v529_v12 = vld [vmem:[%s4678_s2] sm:$0xff]  ;;  %v531_v18 = vld [vmem:[%s4678_s2 + $0x10] sm:$0xff] }
   0x4   :  { %v4297_v14 = vpack.c.bf16 %v43_v5, %v40_v4  ;;  %v4299_v15 = vsub.f32 %v31_v0, %v40_v4  ;;  %v4301_v16 = vsub.f32 %v32_v1, %v43_v5  ;;  %v4303_v17 = vsub.f32 %v33_v2, %v46_v7 }
   0x5   :  { %15 = vsyncpa [#allocation5], 0  ;;  %v4308_v19 = vpack.c.bf16 %v49_v10, %v46_v7  ;;  %v4310_v20 = vsub.f32 %v34_v6, %v49_v10  ;;  %v4312_v21 = vand.u32 4294901760, %v37_v11  ;;  %v534_v22 = vand.u32 4294901760, %v529_v12  ;;  %v532_v27 = vld [vmem:[%s4678_s2 + $0x18] sm:$0xff]  ;;  %s4218_s30 = smov 12  }
   0x6   :  { %3940 = vmatpush3.bf16.msra.mxu1 %v4297_v14  ;;  %v121_v23 = vand.u32 4294901760, %v4299_v15  ;;  %v128_v24 = vand.u32 4294901760, %v4301_v16  ;;  %v537_v25 = vand.u32 4294901760, %v530_v13  ;;  %v135_v26 = vand.u32 4294901760, %v4303_v17  ;;  %s4219_s9 = smov [#allocation4]  }
   0x7   :  { %3941 = vmatprep.subr.bf16.mxu1 %v4213_v3  ;;  %v4323_v28 = vsub.f32 %v37_v11, %v4312_v21  ;;  %v142_v29 = vand.u32 4294901760, %v4310_v20  ;;  %v540_v30 = vand.u32 4294901760, %v531_v18  ;;  %v4332_v33 = vsub.f32 %v529_v12, %v534_v22  ;;  %v1023_v12 = vld [vmem:[%s4680_s4] sm:$0xf]  ;;  %s4216_s4 = smov 4   ;;  %s3414_s10 = sshll.u32 %s4219_s9, 4  ;;  %s3415_s10 = int_to_ptr.vmem [resolvable:$true] %s3414_s10 }
   0x8   :  { %v122_v31 = vsub.f32 %v4299_v15, %v121_v23  ;;  %v129_v32 = vsub.f32 %v4301_v16, %v128_v24  ;;  %v4334_v34 = vsub.f32 %v530_v13, %v537_v25  ;;  %v136_v36 = vsub.f32 %v4303_v17, %v135_v26  ;;  %s4165_s11 = scalar_lea.vmem %s3415_s10, 128  ;;  %p4170_p1 = scmp.lt.s32.totalorder %s3415_s10, %s3415_s10 }
   0x9   :  { %v4337_v35 = vand.u32 4294901760, %v4323_v28  ;;  %v143_v37 = vsub.f32 %v4310_v20, %v142_v29  ;;  %v543_v38 = vand.u32 4294901760, %v532_v27  ;;  %v4346_v41 = vsub.f32 %v531_v18, %v540_v30  ;;  %p4166_p0 = scmp.ne.s32.totalorder %s3415_s10, %s4165_s11  ;;  %p4171_p2 = scmp.lt.s32.totalorder %s4165_s11, %s4165_s11 }
   0xa   :  { %3943 = vmatpush3.bf16.msra.mxu1 %v4308_v19  ;;  %v123_v39 = vand.u32 4294901760, %v122_v31  ;;  %v130_v40 = vand.u32 4294901760, %v129_v32  ;;  %v4351_v43 = vpack.c.bf16 %v537_v25, %v534_v22  ;;  %v137_v44 = vand.u32 4294901760, %v136_v36 }
   0xb   :  { %3974 = vmatprep.subr.bf16.mxu1 %v4213_v3  ;;  %v111_v42 = vsub.f32 %v4323_v28, %v4337_v35  ;;  %v144_v45 = vand.u32 4294901760, %v143_v37  ;;  %v4353_v47 = vsub.f32 %v532_v27, %v543_v38  ;;  %v615_v48 = vand.u32 4294901760, %v4332_v33  ;;  %p4172_p3 = por %p4171_p2, %p4170_p1 }
   0xc   :  { %v3945_v46 = vpack.c.bf16 %v130_v40, %v123_v39  ;;  %v622_v49 = vand.u32 4294901760, %v4334_v34  ;;  %v629_v51 = vand.u32 4294901760, %v4346_v41  ;;  %v4366_v56 = vpack.c.bf16 %v543_v38, %v540_v30 }
   0xd   :  { %v112_v50 = vand.u32 4294901760, %v111_v42  ;;  %v3948_v52 = vpack.c.bf16 %v144_v45, %v137_v44  ;;  %v616_v53 = vsub.f32 %v4332_v33, %v615_v48  ;;  %v636_v55 = vand.u32 4294901760, %v4353_v47  ;;  %p4173_p4 = pnand %p4172_p3, %p4166_p0 }
   0xe   :  { %3946 = vmatpush3.bf16.msra.mxu0 %v3945_v46  ;;  %v623_v54 = vsub.f32 %v4334_v34, %v622_v49  ;;  %v630_v59 = vsub.f32 %v4346_v41, %v629_v51  ;;  %v3951_v61 = vpack.c.bf16 %v4301_v16, %v4299_v15  ;;  %v3954_v1 = vpack.c.bf16 %v4310_v20, %v4303_v17 }
   0xf   :  { %3593 = vmatmul.mubr.f32.vlgmr.msra.gmra.mrb[0].mxu1 %v112_v50  ;;  %3947 = vmatprep.subr.bf16.mxu0 %v4213_v3  ;;  %v617_v57 = vand.u32 4294901760, %v616_v53  ;;  %v637_v60 = vsub.f32 %v4353_v47, %v636_v55  ;;  %v3987_v4 = vpack.c.bf16 %v4334_v34, %v4332_v33  ;;  %v3990_v5 = vpack.c.bf16 %v4353_v47, %v4346_v41  ;;  %v1932_v53 = vld [vmem:[%s4679_s3 + $0x10] sm:$0xff] }
  0x10   :  { %3976 = vmatpush3.bf16.msra.mxu1 %v4351_v43  ;;  %3658 = vmatprep.mubr.msk.f32.mxu1 %vm4214_vm0, %v4215_v8  ;;  %v624_v58 = vand.u32 4294901760, %v623_v54  ;;  %v631_v63 = vand.u32 4294901760, %v630_v59  ;;  %v3963_v6 = vpack.c.bf16 %v128_v24, %v121_v23  ;;  %v3966_v7 = vpack.c.bf16 %v142_v29, %v135_v26  ;;  %v1933_v54 = vld [vmem:[%s4679_s3 + $0x18] sm:$0xff] }
  0x11   :  { %3977 = vmatprep.subr.bf16.mxu1 %v4213_v3  ;;  %v638_v0 = vand.u32 4294901760, %v637_v60  ;;  %v3999_v10 = vpack.c.bf16 %v622_v49, %v615_v48  ;;  %v4002_v11 = vpack.c.bf16 %v636_v55, %v629_v51  ;;  %vm1028_vm2 = vcmask 1043456   ;;  %v1930_v49 = vld [vmem:[%s4679_s3] sm:$0xff] }
  0x12   :  { %3949 = vmatpush3.bf16.msra.mxu0 %v3948_v52  ;;  %v3981_v62 = vpack.c.bf16 %v624_v58, %v617_v57  ;;  %v1030_v13 = vsel %vm1028_vm2, %v1023_v12, 0  ;;  %vm1024_vm3 = vcmask 31744   ;;  %vm3385_vm4 = vcmask 64544  }
  0x13   :  { %3950 = vmatprep.subr.bf16.mxu0 %v4213_v3  ;;  %v3984_v2 = vpack.c.bf16 %v638_v0, %v631_v63  ;;  %v1938_v51 = vand.u32 4294901760, %v1930_v49  ;;  %v1947_v57 = vand.u32 4294901760, %v1933_v54  ;;  %vm3390_vm5 = vcmask 97344  }
  0x14   :  { %3979 = vmatpush3.bf16.msra.mxu1 %v4366_v56  ;;  %vm3396_vm6 = vcmask 130144  }
  0x15   :  { %3604 = vmatmul.mubr.f32.vlgmr.msra.gmra.mrb[0].mxu0 %v4312_v21  ;;  %3980 = vmatprep.subr.bf16.mxu1 %v4213_v3  ;;  %v2018_v58 = vsub.f32 %v1930_v49, %v1938_v51 }
  0x16   :  { %3952 = vmatpush3.bf16.msra.mxu0 %v3951_v61  ;;  %3614 = vmatprep.mubr.msk.f32.mxu0 %vm4214_vm0, %v4215_v8 }
  0x17   :  { %3659 = vmatmul.mubr.f32.vlgmr.msra.gmra.mrb[2].mxu1 %v112_v50  ;;  %3953 = vmatprep.subr.bf16.mxu0 %v4213_v3  ;;  %v1931_v50 = vld [vmem:[%s4679_s3 + $0x8] sm:$0xff]  ;;  %v2019_v61 = vand.u32 4294901760, %v2018_v58  ;;  %s4217_s3 = smov 8  }
  0x18   :  { %3982 = vmatpush3.bf16.msra.mxu1 %v3981_v62  ;;  %3669 = vmatprep.mubr.msk.f32.mxu1 %vm4214_vm0, %v4215_v8  ;;  %v1941_v52 = vand.u32 4294901760, %v1931_v50 }
  0x19   :  { %3983 = vmatprep.subr.bf16.mxu1 %v4213_v3  ;;  %v2020_v63 = vsub.f32 %v2018_v58, %v2019_v61 }
  0x1a   :  { %3955 = vmatpush3.bf16.msra.mxu0 %v3954_v1  ;;  %v4541_v55 = vpack.c.bf16 %v1941_v52, %v1938_v51  ;;  %v2025_v59 = vsub.f32 %v1931_v50, %v1941_v52  ;;  %v2039_v1 = vsub.f32 %v1933_v54, %v1947_v57 }
  0x1b   :  { %3956 = vmatprep.subr.bf16.mxu0 %v4213_v3 }
  0x1c   :  { %3985 = vmatpush3.bf16.msra.mxu1 %v3984_v2  ;;  %v2026_v62 = vand.u32 4294901760, %v2025_v59 }
  0x1d   :  { %3615 = vmatmul.mubr.f32.vlgmr.msra.gmra.mrb[0].mxu0 %v4323_v28  ;;  %3986 = vmatprep.subr.bf16.mxu1 %v4213_v3 }
  0x1e   :  { %3958 = vmatpush3.bf16.msra.mxu0 %v4297_v14  ;;  %3625 = vmatprep.mubr.msk.f32.mxu0 %vm4214_vm0, %v4215_v8  ;;  %v2027_v2 = vsub.f32 %v2025_v59, %v2026_v62 }
  0x1f   :  { %3670 = vmatmul.mubr.f32.vlgmr.msra.gmra.mrb[2].mxu1 %v4312_v21  ;;  %3959 = vmatprep.subr.bf16.mxu0 %v4213_v3 }
  0x20   :  { %3988 = vmatpush3.bf16.msra.mxu1 %v3987_v4  ;;  %3680 = vmatprep.mubr.msk.f32.mxu1 %vm4214_vm0, %v4215_v8  ;;  %v2021_v4 = vand.u32 4294901760, %v2020_v63 }
  0x21   :  { %3989 = vmatprep.subr.bf16.mxu1 %v4213_v3 }
  0x22   :  { %3961 = vmatpush3.bf16.msra.mxu0 %v4308_v19 }
  0x23   :  { %3962 = vmatprep.subr.bf16.mxu0 %v4213_v3 }
  0x24   :  { %3991 = vmatpush3.bf16.msra.mxu1 %v3990_v5 }
  0x25   :  { %3626 = vmatmul.mubr.f32.vlgmr.msra.gmra.mrb[0].mxu0 %v4337_v35  ;;  %3992 = vmatprep.subr.bf16.mxu1 %v4213_v3 }
  0x26   :  { %3964 = vmatpush3.bf16.msra.mxu0 %v3963_v6  ;;  %3636 = vmatprep.mubr.msk.f32.mxu0 %vm4214_vm0, %v4215_v8  ;;  %v2040_v6 = vand.u32 4294901760, %v2039_v1 }
  0x27   :  { %3681 = vmatmul.mubr.f32.vlgmr.msra.gmra.mrb[2].mxu1 %v4323_v28  ;;  %3965 = vmatprep.subr.bf16.mxu0 %v4213_v3 }
  0x28   :  { %3994 = vmatpush3.bf16.msra.mxu1 %v4351_v43  ;;  %3691 = vmatprep.mubr.msk.f32.mxu1 %vm4214_vm0, %v4215_v8 }
  0x29   :  { %3995 = vmatprep.subr.bf16.mxu1 %v4213_v3 }
  0x2a   :  { %3967 = vmatpush3.bf16.msra.mxu0 %v3966_v7  ;;  %v2028_v7 = vand.u32 4294901760, %v2027_v2 }
  0x2b   :  { %3968 = vmatprep.subr.bf16.mxu0 %v4213_v3 }
  0x2c   :  { %3997 = vmatpush3.bf16.msra.mxu1 %v4366_v56  ;;  %v4017_v12 = vpack.c.bf16 %v2028_v7, %v2021_v4 }
  0x2d   :  { %3637 = vmatmul.mubr.f32.vlgmr.msra.gmra.mrb[0].mxu0 %v4312_v21  ;;  %3998 = vmatprep.subr.bf16.mxu1 %v4213_v3 }
  0x2e   :  { %3970 = vmatpush3.bf16.msra.mxu0 %v4297_v14  ;;  %3647 = vmatprep.mubr.msk.f32.mxu0 %vm4214_vm0, %v4215_v8  ;;  %v4466_v14 = vand.u32 4294901760, %v1030_v13 }
  0x2f   :  { %3692 = vmatmul.mubr.f32.vlgmr.msra.gmra.mrb[2].mxu1 %v4337_v35  ;;  %3971 = vmatprep.subr.bf16.mxu0 %v4213_v3 }
  0x30   :  { %4000 = vmatpush3.bf16.msra.mxu1 %v3999_v10  ;;  %3702 = vmatprep.mubr.msk.f32.mxu1 %vm4214_vm0, %v4215_v8  ;;  %v4469_v15 = vsub.f32 %v1030_v13, %v4466_v14 }
  0x31   :  { %4001 = vmatprep.subr.bf16.mxu1 %v4213_v3 }
  0x32   :  { %3973 = vmatpush3.bf16.msra.mxu0 %v4308_v19  ;;  %v4474_v16 = vand.u32 4294901760, %v4469_v15 }
  0x33   :  { %3721 = vmatprep.subr.mxu0 %v4215_v8 }
  0x34   :  { %4003 = vmatpush3.bf16.msra.mxu1 %v4002_v11  ;;  %v1112_v17 = vsub.f32 %v4469_v15, %v4474_v16  ;;  %v2041_v11 = vsub.f32 %v2039_v1, %v2040_v6 }
  0x35   :  { %3648 = vmatmul.mubr.f32.vlgmr.msra.gmra.mrb[0].mxu0 %v4312_v21  ;;  %4004 = vmatprep.subr.bf16.mxu1 %v4213_v3 }
  0x36   :  { %3723 = vmatprep.mubr.msk.f32.mxu0 %vm4214_vm0, %v4215_v8  ;;  %v4478_v18 = vand.u32 4294901760, %v1112_v17  ;;  %v2042_v17 = vand.u32 4294901760, %v2041_v11 }
  0x37   :  { %3703 = vmatmul.mubr.f32.vlgmr.msra.gmra.mrb[2].mxu1 %v4312_v21 }
  0x38   :  { %4006 = vmatpush3.bf16.msra.mxu1 %v4351_v43  ;;  %3713 = vmatprep.mubr.msk.f32.mxu1 %vm4214_vm0, %v4215_v8 }
  0x39   :  { %4007 = vmatprep.subr.bf16.mxu1 %v4213_v3  ;;  %3722 = vmatpush3.msra.mxu0 %v4478_v18 }
  0x3a   :  { %3726 = vmatprep.subr.mxu0 %v4215_v8 }
  0x3c   :  { %4009 = vmatpush3.bf16.msra.mxu1 %v4366_v56  ;;  %v1944_v56 = vand.u32 4294901760, %v1932_v53 }
  0x3d   :  { %3716 = vmatprep.subr.mxu1 %v4215_v8 }
  0x3e   :  { %v4544_v60 = vpack.c.bf16 %v1947_v57, %v1944_v56  ;;  %v2032_v0 = vsub.f32 %v1932_v53, %v1944_v56 }
  0x3f   :  { %3714 = vmatmul.mubr.f32.vlgmr.msra.gmra.mrb[2].mxu1 %v4312_v21 }
  0x40   :  { %3718 = vmatprep.mubr.msk.f32.mxu1 %vm4214_vm0, %v4215_v8  ;;  %3717 = vmatpush3.msra.mxu1 %v4466_v14  ;;  %v2033_v5 = vand.u32 4294901760, %v2032_v0 }
  0x41   :  { %3746 = vmatprep.subr.mxu1 %v4215_v8 }
  0x42   :  { %v2034_v10 = vsub.f32 %v2032_v0, %v2033_v5 }
  0x44   :  { %v2035_v13 = vand.u32 4294901760, %v2034_v10 }
  0xe2   :  { %v114_v19 = vpop.f32.mrb[0].mxu1 }
  0xe3   :  { %v3594_v20 = vpop.f32.mrb[1].mxu1 }
  0xe4   :  { %v4023_v20 = vpack.c.bf16 %v2025_v59, %v2018_v58 }
 0x108   :  { %v520_v21 = vpop.f32.mrb[0].mxu0 }
 0x109   :  { %v4082_v22 = vadd.f32 %v520_v21, %v114_v19  ;;  %v3649_v23 = vpop.f32.mrb[1].mxu0  ;;  %v4020_v19 = vpack.c.bf16 %v2042_v17, %v2035_v13  ;;  %v4553_v21 = vpack.c.bf16 %v2039_v1, %v2032_v0 }
 0x10a   :  { %v4557_v23 = vpack.c.bf16 %v2040_v6, %v2033_v5 }
 0x10b   :  { %v525_v24 = vmul.f32 0.70710677, %v4082_v22  ;;  %v524_v29 = vmul.f32 0.5, %v4082_v22  ;;  %v4555_v22 = vpack.c.bf16 %v2026_v62, %v2019_v61 }
 0x10d   :  { %4159 = verf.f32 %v525_v24 }
 0x112   :  { %v1014_v25 = vpop.f32.mrb[2].mxu1 }
 0x113   :  { %v1019_v26 = vmul.f32 0.70710677, %v1014_v25  ;;  %v3715_v27 = vpop.f32.mrb[3].mxu1  ;;  %v1018_v34 = vmul.f32 0.5, %v1014_v25 }
 0x115   :  { %4161 = verf.f32 %v1019_v26 }
 0x117   :  { %v4160_v28 = vpop.eup %4159 }
 0x118   :  { %v527_v30 = vadd.f32 1.0, %v4160_v28 }
 0x11a   :  { %v528_v31 = vmul.f32 %v527_v30, %v524_v29 }
 0x11c   :  { %v1026_v32 = vsel %vm1024_vm3, %v528_v31, 0  ;;  %3381 = vst.msk [vmem:[#allocation4] sm:$0xff] %vm1024_vm3, %v528_v31 }
 0x11d   :  { %v1098_v33 = vand.u32 4294901760, %v1026_v32 }
 0x11f   :  { %v4162_v35 = vpop.eup %4161  ;;  %v1099_v36 = vsub.f32 %v1026_v32, %v1098_v33  ;;  %3724 = vmatmul.mubr.f32.vlgmr.msra.gmra.mrb[2].mxu0 %v1098_v33 }
 0x120   :  { %v1021_v37 = vadd.f32 1.0, %v4162_v35  ;;  %3727 = vmatpush3.msra.mxu0 %v4469_v15  ;;  %3728 = vmatprep.mubr.msk.f32.mxu0 %vm4214_vm0, %v4215_v8 }
 0x121   :  { %v1100_v38 = vand.u32 4294901760, %v1099_v36  ;;  %3731 = vmatprep.subr.mxu0 %v4215_v8 }
 0x122   :  { %v1022_v39 = vmul.f32 %v1021_v37, %v1018_v34 }
 0x123   :  { %v1101_v40 = vsub.f32 %v1099_v36, %v1100_v38 }
 0x124   :  { %v1479_v41 = vsel %vm1024_vm3, %v1022_v39, 0  ;;  %3382 = vrot.lane.b32.xlu0 %v1022_v39, %s4216_s4 }
 0x125   :  { %v1547_v42 = vand.u32 4294901760, %v1479_v41  ;;  %v1102_v43 = vand.u32 4294901760, %v1101_v40 }
 0x127   :  { %v1548_v44 = vsub.f32 %v1479_v41, %v1547_v42  ;;  %3719 = vmatmul.mubr.f32.vlgmr.msra.gmra.mrb[4].mxu1 %v1102_v43  ;;  %3729 = vmatmul.mubr.f32.vlgmr.msra.gmra.mrb[2].mxu0 %v1099_v36 }
 0x128   :  { %3732 = vmatpush3.msra.mxu0 %v4466_v14  ;;  %3747 = vmatpush3.msra.mxu1 %v4466_v14 }
 0x129   :  { %3748 = vmatprep.mubr.msk.f32.mxu1 %vm4214_vm0, %v4215_v8  ;;  %v1549_v45 = vand.u32 4294901760, %v1548_v44  ;;  %3733 = vmatprep.mubr.msk.f32.mxu0 %vm4214_vm0, %v4215_v8 }
 0x12a   :  { %3736 = vmatprep.subr.mxu0 %v4215_v8  ;;  %3751 = vmatprep.subr.mxu1 %v4215_v8 }
 0x12b   :  { %v1550_v46 = vsub.f32 %v1548_v44, %v1549_v45 }
 0x12d   :  { %v1551_v47 = vand.u32 4294901760, %v1550_v46 }
 0x12f   :  { %3749 = vmatmul.mubr.f32.vlgmr.msra.gmra.mrb[6].mxu1 %v1551_v47  ;;  %3734 = vmatmul.mubr.f32.vlgmr.msra.gmra.mrb[2].mxu0 %v1100_v38 }
 0x130   :  { %3737 = vmatpush3.msra.mxu0 %v4474_v16  ;;  %3752 = vmatpush3.msra.mxu1 %v4478_v18 }
 0x131   :  { %3753 = vmatprep.mubr.msk.f32.mxu1 %vm4214_vm0, %v4215_v8  ;;  %3738 = vmatprep.mubr.msk.f32.mxu0 %vm4214_vm0, %v4215_v8 }
 0x132   :  { %3741 = vmatprep.subr.mxu0 %v4215_v8  ;;  %3756 = vmatprep.subr.mxu1 %v4215_v8 }
 0x137   :  { %3754 = vmatmul.mubr.f32.vlgmr.msra.gmra.mrb[6].mxu1 %v1547_v42  ;;  %3739 = vmatmul.mubr.f32.vlgmr.msra.gmra.mrb[2].mxu0 %v1098_v33 }
 0x138   :  { %3742 = vmatpush3.msra.mxu0 %v4466_v14  ;;  %3757 = vmatpush3.msra.mxu1 %v4469_v15 }
 0x139   :  { %3758 = vmatprep.mubr.msk.f32.mxu1 %vm4214_vm0, %v4215_v8  ;;  %3743 = vmatprep.mubr.msk.f32.mxu0 %vm4214_vm0, %v4215_v8 }
 0x13a   :  { %3761 = vmatprep.subr.mxu1 %v4215_v8  ;;  %4010 = vmatprep.subr.bf16.mxu0 %v4213_v3 }
 0x13f   :  { %3759 = vmatmul.mubr.f32.vlgmr.msra.gmra.mrb[6].mxu1 %v1548_v44  ;;  %3744 = vmatmul.mubr.f32.vlgmr.msra.gmra.mrb[2].mxu0 %v1098_v33 }
 0x140   :  { %3762 = vmatpush3.msra.mxu1 %v4466_v14  ;;  %3763 = vmatprep.mubr.msk.f32.mxu1 %vm4214_vm0, %v4215_v8 }
 0x141   :  { %3766 = vmatprep.subr.mxu1 %v4215_v8  ;;  %3784 = vmatprep.mubr.msk.f32.mxu0 %vm4214_vm0, %v4215_v8 }
 0x142   :  { %4012 = vmatpush3.bf16.msra.mxu0 %v4541_v55 }
 0x143   :  { %4013 = vmatprep.subr.bf16.mxu0 %v4213_v3 }
 0x146   :  { %4015 = vmatpush3.bf16.msra.mxu0 %v4544_v60 }
 0x147   :  { %3764 = vmatmul.mubr.f32.vlgmr.msra.gmra.mrb[6].mxu1 %v1549_v45  ;;  %4016 = vmatprep.subr.bf16.mxu0 %v4213_v3 }
 0x148   :  { %3767 = vmatpush3.msra.mxu1 %v4474_v16  ;;  %3768 = vmatprep.mubr.msk.f32.mxu1 %vm4214_vm0, %v4215_v8 }
 0x149   :  { %3771 = vmatprep.subr.mxu1 %v4215_v8 }
 0x14f   :  { %3769 = vmatmul.mubr.f32.vlgmr.msra.gmra.mrb[6].mxu1 %v1547_v42 }
 0x150   :  { %3772 = vmatpush3.msra.mxu1 %v4466_v14  ;;  %3773 = vmatprep.mubr.msk.f32.mxu1 %vm4214_vm0, %v4215_v8 }
 0x151   :  { %4046 = vmatprep.subr.bf16.mxu1 %v4213_v3 }
 0x157   :  { %3774 = vmatmul.mubr.f32.vlgmr.msra.gmra.mrb[6].mxu1 %v1547_v42 }
 0x158   :  { %3850 = vmatprep.mubr.msk.f32.mxu1 %vm4214_vm0, %v4215_v8  ;;  %4048 = vmatpush3.bf16.msra.mxu1 %v4541_v55 }
 0x159   :  { %4049 = vmatprep.subr.bf16.mxu1 %v4213_v3 }
 0x15c   :  { %4051 = vmatpush3.bf16.msra.mxu1 %v4544_v60 }
 0x15d   :  { %4052 = vmatprep.subr.bf16.mxu1 %v4213_v3 }
 0x196   :  { %v3383_v48 = vpop.permute.xlu0 %3382 }
 0x197   :  { %3386 = vst.msk [vmem:[#allocation4] sm:$0xff] %vm3385_vm4, %v3383_v48 }
 0x1fa   :  { %v1104_v24 = vpop.f32.mrb[4].mxu1 }
 0x1fb   :  { %v3720_v25 = vpop.f32.mrb[5].mxu1 }
 0x212   :  { %v1474_v26 = vpop.f32.mrb[2].mxu0 }
 0x213   :  { %v4083_v27 = vadd.f32 %v1474_v26, %v1104_v24  ;;  %v3745_v28 = vpop.f32.mrb[3].mxu0 }
 0x215   :  { %v4560_v29 = vsub.f32 %v4284_v9, %v4083_v27 }
 0x217   :  { %v1929_v30 = vmul.f32 %v4560_v29, %v4560_v29 }
 0x219   :  { %v1935_v31 = vsel %vm35_vm1, %v1929_v30, 0 }
 0x21a   :  { %v2006_v32 = vand.u32 4294901760, %v1935_v31 }
 0x21c   :  { %v2007_v33 = vsub.f32 %v1935_v31, %v2006_v32 }
 0x21e   :  { %v2008_v34 = vand.u32 4294901760, %v2007_v33 }
 0x220   :  { %v2009_v35 = vsub.f32 %v2007_v33, %v2008_v34 }
 0x222   :  { %v2010_v36 = vand.u32 4294901760, %v2009_v35 }
 0x224   :  { %3785 = vmatmul.mubr.f32.vlgmr.msra.gmra.mrb[4].mxu0 %v2010_v36 }
 0x225   :  { %4018 = vmatpush3.bf16.msra.mxu0 %v4017_v12  ;;  %3795 = vmatprep.mubr.msk.f32.mxu0 %vm4214_vm0, %v4215_v8 }
 0x226   :  { %4019 = vmatprep.subr.bf16.mxu0 %v4213_v3 }
 0x229   :  { %4021 = vmatpush3.bf16.msra.mxu0 %v4020_v19 }
 0x22a   :  { %v1923_v37 = vpop.f32.mrb[6].mxu1  ;;  %4022 = vmatprep.subr.bf16.mxu0 %v4213_v3 }
 0x22b   :  { %v1928_v38 = vsub.f32 %v4284_v9, %v1923_v37  ;;  %v3775_v39 = vpop.f32.mrb[7].mxu1 }
 0x22c   :  { %3796 = vmatmul.mubr.f32.vlgmr.msra.gmra.mrb[4].mxu0 %v2006_v32 }
 0x22d   :  { %v2423_v40 = vmul.f32 %v1928_v38, %v1928_v38  ;;  %4024 = vmatpush3.bf16.msra.mxu0 %v4023_v20  ;;  %3806 = vmatprep.mubr.msk.f32.mxu0 %vm4214_vm0, %v4215_v8 }
 0x22e   :  { %4025 = vmatprep.subr.bf16.mxu0 %v4213_v3 }
 0x22f   :  { %v2425_v41 = vsel %vm35_vm1, %v2423_v40, 0 }
 0x230   :  { %v2496_v42 = vand.u32 4294901760, %v2425_v41 }
 0x231   :  { %4027 = vmatpush3.bf16.msra.mxu0 %v4553_v21 }
 0x232   :  { %v2497_v43 = vsub.f32 %v2425_v41, %v2496_v42  ;;  %4028 = vmatprep.subr.bf16.mxu0 %v4213_v3 }
 0x234   :  { %v2498_v44 = vand.u32 4294901760, %v2497_v43  ;;  %3807 = vmatmul.mubr.f32.vlgmr.msra.gmra.mrb[4].mxu0 %v2007_v33 }
 0x235   :  { %4030 = vmatpush3.bf16.msra.mxu0 %v4541_v55  ;;  %3817 = vmatprep.mubr.msk.f32.mxu0 %vm4214_vm0, %v4215_v8 }
 0x236   :  { %4031 = vmatprep.subr.bf16.mxu0 %v4213_v3  ;;  %v2499_v9 = vsub.f32 %v2497_v43, %v2498_v44 }
 0x238   :  { %v2500_v45 = vand.u32 4294901760, %v2499_v9 }
 0x239   :  { %4033 = vmatpush3.bf16.msra.mxu0 %v4544_v60 }
 0x23a   :  { %3851 = vmatmul.mubr.f32.vlgmr.msra.gmra.mrb[8].mxu1 %v2500_v45  ;;  %4034 = vmatprep.subr.bf16.mxu0 %v4213_v3 }
 0x23b   :  { %4054 = vmatpush3.bf16.msra.mxu1 %v4017_v12  ;;  %3861 = vmatprep.mubr.msk.f32.mxu1 %vm4214_vm0, %v4215_v8 }
 0x23c   :  { %3818 = vmatmul.mubr.f32.vlgmr.msra.gmra.mrb[4].mxu0 %v2008_v34  ;;  %4055 = vmatprep.subr.bf16.mxu1 %v4213_v3 }
 0x23d   :  { %4036 = vmatpush3.bf16.msra.mxu0 %v4555_v22  ;;  %3828 = vmatprep.mubr.msk.f32.mxu0 %vm4214_vm0, %v4215_v8 }
 0x23e   :  { %4037 = vmatprep.subr.bf16.mxu0 %v4213_v3 }
 0x23f   :  { %4057 = vmatpush3.bf16.msra.mxu1 %v4020_v19 }
 0x240   :  { %4058 = vmatprep.subr.bf16.mxu1 %v4213_v3 }
 0x241   :  { %4039 = vmatpush3.bf16.msra.mxu0 %v4557_v23 }
 0x242   :  { %3862 = vmatmul.mubr.f32.vlgmr.msra.gmra.mrb[8].mxu1 %v2496_v42  ;;  %4040 = vmatprep.subr.bf16.mxu0 %v4213_v3 }
 0x243   :  { %4060 = vmatpush3.bf16.msra.mxu1 %v4023_v20  ;;  %3872 = vmatprep.mubr.msk.f32.mxu1 %vm4214_vm0, %v4215_v8 }
 0x244   :  { %3829 = vmatmul.mubr.f32.vlgmr.msra.gmra.mrb[4].mxu0 %v2006_v32  ;;  %4061 = vmatprep.subr.bf16.mxu1 %v4213_v3 }
 0x245   :  { %4042 = vmatpush3.bf16.msra.mxu0 %v4541_v55  ;;  %3839 = vmatprep.mubr.msk.f32.mxu0 %vm4214_vm0, %v4215_v8 }
 0x246   :  { %4043 = vmatprep.subr.bf16.mxu0 %v4213_v3 }
 0x247   :  { %4063 = vmatpush3.bf16.msra.mxu1 %v4553_v21 }
 0x248   :  { %4064 = vmatprep.subr.bf16.mxu1 %v4213_v3 }
 0x249   :  { %4045 = vmatpush3.bf16.msra.mxu0 %v4544_v60 }
 0x24a   :  { %3873 = vmatmul.mubr.f32.vlgmr.msra.gmra.mrb[8].mxu1 %v2497_v43  ;;  %3908 = vmatprep.subr.mxu0 %v4215_v8 }
 0x24b   :  { %4066 = vmatpush3.bf16.msra.mxu1 %v4541_v55  ;;  %3883 = vmatprep.mubr.msk.f32.mxu1 %vm4214_vm0, %v4215_v8 }
 0x24c   :  { %3840 = vmatmul.mubr.f32.vlgmr.msra.gmra.mrb[4].mxu0 %v2006_v32  ;;  %4067 = vmatprep.subr.bf16.mxu1 %v4213_v3 }
 0x24d   :  { %3909 = vmatpush3.msra.mxu0 %v4466_v14  ;;  %3910 = vmatprep.mubr.msk.f32.mxu0 %vm4214_vm0, %v4215_v8 }
 0x24e   :  { %3913 = vmatprep.subr.mxu0 %v4215_v8 }
 0x24f   :  { %4069 = vmatpush3.bf16.msra.mxu1 %v4544_v60 }
 0x250   :  { %4070 = vmatprep.subr.bf16.mxu1 %v4213_v3 }
 0x252   :  { %3884 = vmatmul.mubr.f32.vlgmr.msra.gmra.mrb[8].mxu1 %v2498_v44 }
 0x253   :  { %4072 = vmatpush3.bf16.msra.mxu1 %v4555_v22  ;;  %3894 = vmatprep.mubr.msk.f32.mxu1 %vm4214_vm0, %v4215_v8 }
 0x254   :  { %4073 = vmatprep.subr.bf16.mxu1 %v4213_v3 }
 0x257   :  { %4075 = vmatpush3.bf16.msra.mxu1 %v4557_v23 }
 0x258   :  { %4076 = vmatprep.subr.bf16.mxu1 %v4213_v3 }
 0x25a   :  { %3895 = vmatmul.mubr.f32.vlgmr.msra.gmra.mrb[8].mxu1 %v2496_v42 }
 0x25b   :  { %4078 = vmatpush3.bf16.msra.mxu1 %v4541_v55  ;;  %3905 = vmatprep.mubr.msk.f32.mxu1 %vm4214_vm0, %v4215_v8 }
 0x25c   :  { %4079 = vmatprep.subr.bf16.mxu1 %v4213_v3 }
 0x25f   :  { %4081 = vmatpush3.bf16.msra.mxu1 %v4544_v60 }
 0x262   :  { %3906 = vmatmul.mubr.f32.vlgmr.msra.gmra.mrb[8].mxu1 %v2496_v42 }
 0x31f   :  { %v2418_v46 = vpop.f32.mrb[4].mxu0 }
 0x320   :  { %v2422_v47 = vmul.f32 0.14285715, %v2418_v46  ;;  %v3841_v48 = vpop.f32.mrb[5].mxu0 }
 0x322   :  { %v2914_v49 = vsel %vm1024_vm3, %v2422_v47, 0  ;;  %3387 = vrot.lane.b32.xlu0 %v2422_v47, %s4217_s3 }
 0x323   :  { %v2982_v50 = vand.u32 4294901760, %v2914_v49 }
 0x325   :  { %v2983_v51 = vsub.f32 %v2914_v49, %v2982_v50 }
 0x327   :  { %v2984_v52 = vand.u32 4294901760, %v2983_v51 }
 0x329   :  { %v2985_v53 = vsub.f32 %v2983_v51, %v2984_v52 }
 0x32b   :  { %v2986_v54 = vand.u32 4294901760, %v2985_v53 }
 0x32d   :  { %3911 = vmatmul.mubr.f32.vlgmr.msra.gmra.mrb[6].mxu0 %v2986_v54 }
 0x32e   :  { %3914 = vmatpush3.msra.mxu0 %v4478_v18  ;;  %3915 = vmatprep.mubr.msk.f32.mxu0 %vm4214_vm0, %v4215_v8 }
 0x32f   :  { %3918 = vmatprep.subr.mxu0 %v4215_v8 }
 0x335   :  { %v2908_v3 = vpop.f32.mrb[8].mxu1  ;;  %3916 = vmatmul.mubr.f32.vlgmr.msra.gmra.mrb[6].mxu0 %v2982_v50 }
 0x336   :  { %v2912_v55 = vmul.f32 0.14285715, %v2908_v3  ;;  %v3907_v56 = vpop.f32.mrb[9].mxu1  ;;  %3919 = vmatpush3.msra.mxu0 %v4469_v15  ;;  %3920 = vmatprep.mubr.msk.f32.mxu0 %vm4214_vm0, %v4215_v8 }
 0x337   :  { %3923 = vmatprep.subr.mxu0 %v4215_v8 }
 0x338   :  { %3393 = vrot.lane.b32.xlu1 %v2912_v55, %s4218_s30 }
 0x33d   :  { %3921 = vmatmul.mubr.f32.vlgmr.msra.gmra.mrb[6].mxu0 %v2983_v51 }
 0x33e   :  { %3924 = vmatpush3.msra.mxu0 %v4466_v14  ;;  %3925 = vmatprep.mubr.msk.f32.mxu0 %vm4214_vm0, %v4215_v8 }
 0x33f   :  { %3928 = vmatprep.subr.mxu0 %v4215_v8 }
 0x345   :  { %3926 = vmatmul.mubr.f32.vlgmr.msra.gmra.mrb[6].mxu0 %v2984_v52 }
 0x346   :  { %3929 = vmatpush3.msra.mxu0 %v4474_v16  ;;  %3930 = vmatprep.mubr.msk.f32.mxu0 %vm4214_vm0, %v4215_v8 }
 0x347   :  { %3933 = vmatprep.subr.mxu0 %v4215_v8 }
 0x34d   :  { %3931 = vmatmul.mubr.f32.vlgmr.msra.gmra.mrb[6].mxu0 %v2982_v50 }
 0x34e   :  { %3934 = vmatpush3.msra.mxu0 %v4466_v14  ;;  %3935 = vmatprep.mubr.msk.f32.mxu0 %vm4214_vm0, %v4215_v8 }
 0x355   :  { %3936 = vmatmul.mubr.f32.vlgmr.msra.gmra.mrb[6].mxu0 %v2982_v50 }
 0x394   :  { %v3388_v15 = vpop.permute.xlu0 %3387 }
 0x395   :  { %3391 = vst.msk [vmem:[#allocation4] sm:$0xff] %vm3390_vm5, %v3388_v15 }
 0x3aa   :  { %v3394_v18 = vpop.permute.xlu1 %3393 }
 0x3ab   :  { %3397 = vst.msk [vmem:[#allocation4] sm:$0xff] %vm3396_vm6, %v3394_v18 }
 0x3ac   :  { %4176 = shalt.err (!%p4173_p4)
}
 0x3ad   :  { %s4177_s14 = scalar_lea.hbm %s4684_s8, 128 }
 0x3ae   :  { %p4178_p5 = scmp.ne.s32.totalorder %s4684_s8, %s4177_s14  ;;  %p4181_p6 = scmp.lt.u32.totalorder %s4177_s14, %s4684_s8 }
 0x3b0   :  { %p4183_p7 = pnand %p4181_p6, %p4178_p5 }
 0x3b2   :  { %4186 = shalt.err (!%p4183_p7)
}
 0x3b3   :  { %3417 = dma.vmem_to_hbm [thread:$0]  %s3415_s10, 128, %s4684_s8, [#allocation5]   ;;  %v3426_v57 = vld [vmem:[%s4681_s5] ss:$0 sm:$0xff] }
 0x3b4   :  { %v3427_v60 = vld [vmem:[%s4682_s6] ss:$0 sm:$0xff]  ;;  %s4220_s4 = smov [#allocation2]  }
 0x3b5   :  { %s3404_s22 = sshll.u32 %s4220_s4, 4  ;;  %s3405_s22 = int_to_ptr.vmem [resolvable:$true] %s3404_s22 }
 0x3b6   :  { %s4187_s8 = scalar_lea.vmem %s3405_s22, 128  ;;  %p4192_p9 = scmp.lt.s32.totalorder %s3405_s22, %s3405_s22 }
 0x3b7   :  { %p4188_p8 = scmp.ne.s32.totalorder %s3405_s22, %s4187_s8  ;;  %p4193_p10 = scmp.lt.s32.totalorder %s4187_s8, %s4187_s8 }
 0x3b9   :  { %p4194_p11 = por %p4193_p10, %p4192_p9 }
 0x3bb   :  { %p4195_p12 = pnand %p4194_p11, %p4188_p8 }
 0x428   :  { %v3358_v8 = vpop.f32.mrb[6].mxu0 }
 0x429   :  { %v4084_v14 = vadd.f32 1e-08, %v3358_v8  ;;  %v3937_v16 = vpop.f32.mrb[7].mxu0 }
 0x42b   :  { %4163 = vrsqrt.f32 %v4084_v14 }
 0x435   :  { %v4164_v58 = vpop.eup %4163 }
 0x436   :  { %v3370_v59 = vmul.f32 %v4164_v58, %v3426_v57 }
 0x438   :  { %v3371_v61 = vmul.f32 %v3370_v59, %v4560_v29 }
 0x43a   :  { %v3379_v62 = vadd.f32 %v3427_v60, %v3371_v61 }
 0x43c   :  { %3380 = vst.msk [vmem:[#allocation2] sm:$0xff] %vm35_vm1, %v3379_v62 }
 0x43d   :  { %4198 = shalt.err (!%p4195_p12)
}
 0x43e   :  { %s4199_s24 = scalar_lea.hbm %s4683_s7, 128 }
 0x43f   :  { %p4200_p13 = scmp.ne.s32.totalorder %s4683_s7, %s4199_s24  ;;  %p4203_p0 = scmp.lt.u32.totalorder %s4199_s24, %s4683_s7 }
 0x441   :  { %p4205_p1 = pnand %p4203_p0, %p4200_p13 }
 0x443   :  { %4208 = shalt.err (!%p4205_p1)
}
 0x444   :  { %3407 = dma.vmem_to_hbm [thread:$0]  %s3405_s22, 128, %s4683_s7, [#allocation3]  }
 0x445   :  { %4209 = dma.done.wait [#allocation3], 128  }
 0x446   :  { %4210 = vsyncadd [#allocation3], 4294967168 }
 0x447   :  { %4211 = dma.done.wait [#allocation5], 128  }
 0x448   :  { %4212 = vsyncadd [#allocation5], 4294967168 }
 0x449   :  { %3424 = vsyncpa [#allocation3], 1 }
 0x44a   :  { %3425 = vsyncpa [#allocation5], 1 }

</bundles_post_ra>
